<compile_context>
chip_gen: v7x
topology: tpu7x:2x2x1
jax: 0.10.0
libtpu: 0.0.40
codegen_flags: <defaults>
</compile_context>

<pallas_src>
import jax
import jax.numpy as jnp
from jax import lax
from jax.experimental import pallas as pl
from jax.experimental.pallas import tpu as pltpu


# ----------------------------------------------------------------------------
# 1x1 conv: per-pixel matmul + bias, tiled over the flattened N*H*W axis.
# ----------------------------------------------------------------------------
def _conv1x1_kernel(x_ref, w_ref, b_ref, o_ref):
    # x_ref: (TM, Cin), w_ref: (Cin, Cout), b_ref: (1, Cout), o_ref: (TM, Cout)
    o_ref[...] = (
        jnp.dot(x_ref[...], w_ref[...], preferred_element_type=jnp.float32)
        + b_ref[...]
    ).astype(o_ref.dtype)


def conv1x1(x, w, b, *, tile_m=512):
    """1x1 conv + bias.  x: (N,H,W,Cin) -> (N,H,W,Cout)."""
    n, h, wdim, cin = x.shape
    cout = w.shape[1]
    m = n * h * wdim
    xf = x.reshape(m, cin)                 # metadata-only layout glue
    tm = m if m <= tile_m else tile_m      # tile_m is a multiple of 8
    out = pl.pallas_call(
        _conv1x1_kernel,
        out_shape=jax.ShapeDtypeStruct((m, cout), x.dtype),
        grid=(pl.cdiv(m, tm),),
        in_specs=[
            pl.BlockSpec((tm, cin), lambda i: (i, 0)),
            pl.BlockSpec((cin, cout), lambda i: (0, 0)),
            pl.BlockSpec((1, cout), lambda i: (0, 0)),
        ],
        out_specs=pl.BlockSpec((tm, cout), lambda i: (i, 0)),
        compiler_params=pltpu.CompilerParams(dimension_semantics=("parallel",)),
    )(xf, w, b.reshape(1, cout))
    return out.reshape(n, h, wdim, cout)


# ----------------------------------------------------------------------------
# 3x3 conv (padding=1, stride 1 or 2), optional fused residual add.
# Halo + accumulator live in VMEM scratch; no wrapper-side jnp.pad.
# ----------------------------------------------------------------------------
def _make_conv3x3_kernel(h, w, h_out, w_out, stride, with_residual):
    wp = w + 2

    def kernel(x_ref, w_ref, b_ref, *rest):
        if with_residual:
            res_ref, o_ref, xsc, acc = rest
        else:
            o_ref, xsc, acc = rest
        cin = x_ref.shape[-1]
        cout = o_ref.shape[-1]

        # Build the 1-pixel zero halo inside VMEM (avoids a full extra HBM
        # read+write of the feature map that jnp.pad in the wrapper cost).
        xsc[...] = jnp.zeros_like(xsc)
        xsc[pl.ds(1, h), pl.ds(1, w), :] = x_ref[0]

        # f32 accumulator in VMEM scratch.
        acc[...] = jnp.zeros_like(acc)

        if stride == 1:
            # For each ky: one contiguous row slab (h_out, wp, cin) -> single
            # cheap flatten feeding 3 MXU matmuls; the kx shift is applied as
            # an unstrided slice of the product (no per-tap offset reshapes).
            for ky in range(3):
                slab = xsc[pl.ds(ky, h_out), :, :].reshape(h_out * wp, cin)
                for kx in range(3):
                    prod = jnp.dot(slab, w_ref[ky, kx],
                                   preferred_element_type=jnp.float32)
                    acc[...] += prod.reshape(h_out, wp, cout)[:, kx:kx + w_out, :]
        else:
            # Stride-2 taps: unstrided Ref load of the tap span, then decimate
            # the loaded *value* (strided Ref indexing is not supported).
            span_h = 2 * (h_out - 1) + 1
            span_w = 2 * (w_out - 1) + 1
            for ky in range(3):
                for kx in range(3):
                    patch = xsc[pl.ds(ky, span_h), pl.ds(kx, span_w), :]
                    patch = patch[::2, ::2, :]
                    prod = jnp.dot(patch.reshape(h_out * w_out, cin),
                                   w_ref[ky, kx],
                                   preferred_element_type=jnp.float32)
                    acc[...] += prod.reshape(h_out, w_out, cout)

        out = acc[...] + b_ref[...].astype(jnp.float32)
        if with_residual:
            out = out + res_ref[0].astype(jnp.float32)
        o_ref[0] = out.astype(o_ref.dtype)

    return kernel


def conv3x3(x, w, b, *, stride=1, residual=None):
    """3x3 conv, padding=1, stride 1 or 2, optional residual added to output.

    x: (N,H,W,Cin), w: (3,3,Cin,Cout), b: (Cout,), residual: (N,Hout,Wout,Cout).
    """
    n, h, wdim, cin = x.shape
    cout = w.shape[-1]
    h_out = (h - 1) // stride + 1
    w_out = (wdim - 1) // stride + 1

    kernel = _make_conv3x3_kernel(h, wdim, h_out, w_out, stride,
                                  residual is not None)
    in_specs = [
        pl.BlockSpec((1, h, wdim, cin), lambda nidx: (nidx, 0, 0, 0)),
        pl.BlockSpec((3, 3, cin, cout), lambda nidx: (0, 0, 0, 0)),
        pl.BlockSpec((1, cout), lambda nidx: (0, 0)),
    ]
    args = [x, w, b.reshape(1, cout)]
    if residual is not None:
        in_specs.append(
            pl.BlockSpec((1, h_out, w_out, cout), lambda nidx: (nidx, 0, 0, 0)))
        args.append(residual)

    return pl.pallas_call(
        kernel,
        out_shape=jax.ShapeDtypeStruct((n, h_out, w_out, cout), x.dtype),
        grid=(n,),
        in_specs=in_specs,
        out_specs=pl.BlockSpec((1, h_out, w_out, cout),
                               lambda nidx: (nidx, 0, 0, 0)),
        scratch_shapes=[
            pltpu.VMEM((h + 2, wdim + 2, cin), x.dtype),      # padded input
            pltpu.VMEM((h_out, w_out, cout), jnp.float32),    # f32 accumulator
        ],
        compiler_params=pltpu.CompilerParams(
            dimension_semantics=("parallel",),
            vmem_limit_bytes=64 * 1024 * 1024,
        ),
    )(*args)


# ----------------------------------------------------------------------------
# Fused nearest-2x upsample + lateral add (top-down path).
# ----------------------------------------------------------------------------
def _upsample_add_kernel(fine_ref, coarse_ref, o_ref):
    # fine_ref: (1, 2h, 2w, C); coarse_ref: (1, h, w, C)
    c = coarse_ref[0]
    h, w, ch = c.shape
    up = jnp.broadcast_to(c[:, None, :, None, :], (h, 2, w, 2, ch)
                          ).reshape(2 * h, 2 * w, ch)   # nearest-neighbour x2
    o_ref[0] = fine_ref[0] + up.astype(o_ref.dtype)


def upsample2x_add(fine, coarse):
    """fine + nearest_2x(coarse), fused (no HBM-materialized upsampled map)."""
    n, hf, wf, c = fine.shape
    _, hc, wc, cc = coarse.shape
    assert hf == 2 * hc and wf == 2 * wc and c == cc, (fine.shape, coarse.shape)
    return pl.pallas_call(
        _upsample_add_kernel,
        out_shape=jax.ShapeDtypeStruct(fine.shape, fine.dtype),
        grid=(n,),
        in_specs=[
            pl.BlockSpec((1, hf, wf, c), lambda i: (i, 0, 0, 0)),
            pl.BlockSpec((1, hc, wc, c), lambda i: (i, 0, 0, 0)),
        ],
        out_specs=pl.BlockSpec((1, hf, wf, c), lambda i: (i, 0, 0, 0)),
        compiler_params=pltpu.CompilerParams(dimension_semantics=("parallel",)),
    )(fine, coarse)


# ----------------------------------------------------------------------------
# F.max_pool2d(x, 1, stride=2) == stride-2 spatial subsampling.
# Row decimation happens at the BlockSpec/DMA level (odd rows never enter
# VMEM); column parity is folded into the channel axis and selected in-kernel.
# ----------------------------------------------------------------------------
def _subsample2_kernel(x_ref, o_ref):
    # x_ref: (1, h2, 1, w2, 2*C) -- even rows only; even cols are channels [:C].
    c = o_ref.shape[-1]
    v = x_ref[0, :, 0, :, :]
    o_ref[0] = v[:, :, :c]


def subsample2(x):
    n, h, wdim, c = x.shape
    assert h % 2 == 0 and wdim % 2 == 0, "even spatial dims expected"
    h2, w2 = h // 2, wdim // 2
    xr = x.reshape(n, h2, 2, w2, 2 * c)   # metadata-only reshape
    return pl.pallas_call(
        _subsample2_kernel,
        out_shape=jax.ShapeDtypeStruct((n, h2, w2, c), x.dtype),
        grid=(n,),
        in_specs=[pl.BlockSpec((1, h2, 1, w2, 2 * c),
                               lambda i: (i, 0, 0, 0, 0))],
        out_specs=pl.BlockSpec((1, h2, w2, c), lambda i: (i, 0, 0, 0)),
        compiler_params=pltpu.CompilerParams(dimension_semantics=("parallel",)),
    )(xr)


# ----------------------------------------------------------------------------
# Parameters (deterministic xavier-uniform, zero bias)
# ----------------------------------------------------------------------------
def _xavier_uniform(key, shape, fan_in, fan_out):
    bound = (6.0 / (fan_in + fan_out)) ** 0.5
    return jax.random.uniform(key, shape, jnp.float32, -bound, bound)


def init_pafpn_params(key, in_channels, out_channels):
    L = len(in_channels)
    params = {"lateral": [], "fpn": [], "pa1": [], "pa2": []}
    keys = jax.random.split(key, 4 * L)
    ki = 0
    zeros = jnp.zeros((out_channels,), jnp.float32)
    for i in range(L):
        cin = in_channels[i]
        w = _xavier_uniform(keys[ki], (cin, out_channels), cin, out_channels)
        ki += 1
        params["lateral"].append((w, zeros))
        w = _xavier_uniform(keys[ki], (3, 3, out_channels, out_channels),
                            9 * out_channels, 9 * out_channels)
        ki += 1
        params["fpn"].append((w, zeros))
        if i < L - 1:
            w = _xavier_uniform(keys[ki], (3, 3, out_channels, out_channels),
                                9 * out_channels, 9 * out_channels)
            ki += 1
            params["pa1"].append((w, zeros))
            w = _xavier_uniform(keys[ki], (3, 3, out_channels, out_channels),
                                9 * out_channels, 9 * out_channels)
            ki += 1
            params["pa2"].append((w, zeros))
    return params


# ----------------------------------------------------------------------------
# PAFPN forward (Pallas) and pure-JAX reference
# ----------------------------------------------------------------------------
def pafpn_forward(params, inputs_nchw, num_outs):
    # inputs_nchw: list of (N, C_i, H_i, W_i) like the PyTorch module
    inputs = [jnp.transpose(x, (0, 2, 3, 1)) for x in inputs_nchw]  # -> NHWC
    L = len(inputs)

    # lateral 1x1 convs
    laterals = [conv1x1(inputs[i], *params["lateral"][i]) for i in range(L)]

    # top-down path: fused nearest-2x upsample + add (one kernel per level)
    for i in range(L - 1, 0, -1):
        laterals[i - 1] = upsample2x_add(laterals[i - 1], laterals[i])

    # per-level 3x3 fpn convs
    outs = [conv3x3(laterals[i], *params["fpn"][i]) for i in range(L)]

    # bottom-up path aggregation: outs[i] = pa2(outs[i] + pa1(outs[i-1]))
    for i in range(1, L):
        s = conv3x3(outs[i - 1], *params["pa1"][i - 1], stride=2,
                    residual=outs[i])
        outs[i] = conv3x3(s, *params["pa2"][i - 1])

    # extra levels via max_pool2d(1, stride=2) (add_extra_convs=False path)
    for _ in range(num_outs - L):
        outs.append(subsample2(outs[-1]))

    return tuple(jnp.transpose(o, (0, 3, 1, 2)) for o in outs)  # back to NCHW


def _ref_conv(x, w, b, stride=1, padding=1):
    out = lax.conv_general_dilated(
        x, w, window_strides=(stride, stride),
        padding=((padding, padding), (padding, padding)),
        dimension_numbers=("NHWC", "HWIO", "NHWC"))
    return out + b.reshape(1, 1, 1, -1)


def pafpn_reference(params, inputs_nchw, num_outs):
    inputs = [jnp.transpose(x, (0, 2, 3, 1)) for x in inputs_nchw]
    L = len(inputs)
    laterals = [
        _ref_conv(inputs[i],
                  params["lateral"][i][0].reshape(1, 1,
                                                  *params["lateral"][i][0].shape),
                  params["lateral"][i][1], stride=1, padding=0)
        for i in range(L)
    ]
    for i in range(L - 1, 0, -1):
        up = jnp.repeat(jnp.repeat(laterals[i], 2, axis=1), 2, axis=2)
        laterals[i - 1] = laterals[i - 1] + up
    outs = [_ref_conv(laterals[i], *params["fpn"][i]) for i in range(L)]
    for i in range(1, L):
        s = outs[i] + _ref_conv(outs[i - 1], *params["pa1"][i - 1], stride=2)
        outs[i] = _ref_conv(s, *params["pa2"][i - 1])
    for _ in range(num_outs - L):
        outs.append(outs[-1][:, ::2, ::2, :])
    return tuple(jnp.transpose(o, (0, 3, 1, 2)) for o in outs)


# ----------------------------------------------------------------------------
if __name__ == "__main__":
    key = jax.random.PRNGKey(0)
    in_channels = [4, 8, 16]
    out_channels = 8
    num_outs = 5
    N = 2
    spatial = [16, 8, 4]

    k_in, k_par = jax.random.split(key)
    in_keys = jax.random.split(k_in, len(in_channels))
    inputs = [
        jax.random.normal(in_keys[i],
                          (N, in_channels[i], spatial[i], spatial[i]),
                          jnp.float32)
        for i in range(len(in_channels))
    ]
    params = init_pafpn_params(k_par, in_channels, out_channels)

    outs = pafpn_forward(params, inputs, num_outs)
    outs = jax.block_until_ready(outs)

    refs = pafpn_reference(params, inputs, num_outs)
    for o, r in zip(outs, refs):
        assert o.shape == r.shape, (o.shape, r.shape)
        assert jnp.allclose(o, r, rtol=1e-4, atol=1e-4), float(jnp.abs(o - r).max())

    print("KERNEL_OK")
</pallas_src>

<mosaic_0001>
module attributes {stable_mosaic.version = 11 : i64} {
  func.func @_conv1x1_kernel(%arg0: i32, %arg1: memref<512x4xf32, #tpu.memory_space<vmem>>, %arg2: memref<4x8xf32, #tpu.memory_space<vmem>>, %arg3: memref<1x8xf32, #tpu.memory_space<vmem>>, %arg4: memref<512x8xf32, #tpu.memory_space<vmem>>) attributes {dimension_semantics = [#tpu.dimension_semantics<parallel>], iteration_bounds = array<i64: 1>, scalar_prefetch = 0 : i64, scratch_operands = 0 : i64, tpu.core_type = #tpu.core_type<tc>, window_params = [{transform_indices = @transform_0, window_bounds = array<i64: 512, 4>}, {pipeline_mode = #tpu.pipeline_mode<synchronous>, transform_indices = @transform_1, window_bounds = array<i64: 4, 8>}, {pipeline_mode = #tpu.pipeline_mode<synchronous>, transform_indices = @transform_2, window_bounds = array<i64: 1, 8>}, {transform_indices = @transform_3, window_bounds = array<i64: 512, 8>}]} {
    %c0 = arith.constant 0 : index
    %c0_0 = arith.constant 0 : index
    %0 = vector.load %arg1[%c0, %c0_0] : memref<512x4xf32, #tpu.memory_space<vmem>>, vector<512x4xf32>
    %c0_1 = arith.constant 0 : index
    %c0_2 = arith.constant 0 : index
    %1 = vector.load %arg2[%c0_1, %c0_2] : memref<4x8xf32, #tpu.memory_space<vmem>>, vector<4x8xf32>
    %cst = arith.constant dense<0.000000e+00> : vector<512x8xf32>
    %2 = tpu.matmul %0, %1, %cst {dimension_numbers = #tpu.dot_dimension_numbers<[1], [0], [0], [1], [0, 0, 1, 1], [], []>} : vector<512x4xf32>, vector<4x8xf32>, vector<512x8xf32> -> vector<512x8xf32>
    %c0_3 = arith.constant 0 : index
    %c0_4 = arith.constant 0 : index
    %3 = vector.load %arg3[%c0_3, %c0_4] : memref<1x8xf32, #tpu.memory_space<vmem>>, vector<1x8xf32>
    %4 = vector.broadcast %3 : vector<1x8xf32> to vector<512x8xf32>
    %5 = arith.addf %2, %4 : vector<512x8xf32>
    %c0_5 = arith.constant 0 : index
    %c0_6 = arith.constant 0 : index
    %6 = vector.load %arg4[%c0_5, %c0_6] : memref<512x8xf32, #tpu.memory_space<vmem>>, vector<512x8xf32>
    tpu.vector_store %arg4[%c0_5, %c0_6], %5 {strides = array<i32>} : memref<512x8xf32, #tpu.memory_space<vmem>>, vector<512x8xf32>,
    return
  }
  func.func @transform_0(%arg0: i32) -> (i32, i32) {
    %c0_i32 = arith.constant 0 : i32
    %c0_i32_0 = arith.constant 0 : i32
    return %arg0, %c0_i32 : i32, i32
  }
  func.func @transform_1(%arg0: i32) -> (i32, i32) {
    %c0_i32 = arith.constant 0 : i32
    %c0_i32_0 = arith.constant 0 : i32
    %c0_i32_1 = arith.constant 0 : i32
    return %c0_i32, %c0_i32_0 : i32, i32
  }
  func.func @transform_2(%arg0: i32) -> (i32, i32) {
    %c0_i32 = arith.constant 0 : i32
    %c0_i32_0 = arith.constant 0 : i32
    %c0_i32_1 = arith.constant 0 : i32
    return %c0_i32, %c0_i32_0 : i32, i32
  }
  func.func @transform_3(%arg0: i32) -> (i32, i32) {
    %c0_i32 = arith.constant 0 : i32
    %c0_i32_0 = arith.constant 0 : i32
    return %arg0, %c0_i32 : i32, i32
  }
}

</mosaic_0001>

<bundles_post_ra>
// kernel: tpu_custom_call.1
= control target key start
LH: loop header
LB: loop body
LE: loop exit
PB: predicated region body
PF: predicated region fallthrough
CT: control target
= control target key end

     0   :  { %vm279_vm0 = vcmask 1043456   ;;  %vm86_vm1 = vcmask 31744   ;;  %vm668_vm2 = vcmask 64512   ;;  %s1572_s1 = inlined_call_operand.vmem [shape: f32[4,8], index: 1, kind: input, shape index: {}]   ;;  %s1573_s0 = inlined_call_operand.vmem [shape: f32[512,4], index: 0, kind: input, shape index: {}]   ;;  %s1574_s2 = inlined_call_operand.vmem [shape: f32[1,8], index: 2, kind: input, shape index: {}]   ;;  %s1575_s3 = inlined_call_operand.vmem [shape: f32[512,8], index: 3, kind: output, shape index: {}]  }
   0x1   :  { %v78_v0 = vld [vmem:[%s1572_s1] sm:$0xf]  ;;  %v15_v3 = vld [vmem:[%s1573_s0 + $0x8] sm:$0xff]  ;;  %v16_v5 = vld [vmem:[%s1573_s0 + $0x10] sm:$0xff] }
   0x2   :  { %v14_v1 = vld [vmem:[%s1573_s0] sm:$0xff]  ;;  %868 = vmatprep.subr.msk.mxu0 %vm279_vm0, %v78_v0  ;;  %966 = vmatprep.subr.msk.mxu1 %vm279_vm0, %v78_v0  ;;  %v47_v4 = vld [vmem:[%s1573_s0 + $0x108] sm:$0xff]  ;;  %v48_v6 = vld [vmem:[%s1573_s0 + $0x110] sm:$0xff] }
   0x3   :  { %v46_v2 = vld [vmem:[%s1573_s0 + $0x100] sm:$0xff]  ;;  %869 = vmatpush3.msk.msra.mxu0 %vm279_vm0, %v78_v0  ;;  %967 = vmatpush3.msk.msra.mxu1 %vm279_vm0, %v78_v0  ;;  %v17_v7 = vld [vmem:[%s1573_s0 + $0x18] sm:$0xff]  ;;  %v19_v11 = vld [vmem:[%s1573_s0 + $0x28] sm:$0xff] }
   0x4   :  { %870 = vmatprep.mubr.msk.f32.mxu0 %vm86_vm1, %v14_v1  ;;  %918 = vmatprep.mubr.msk.f32.mxu1 %vm86_vm1, %v46_v2  ;;  %v49_v8 = vld [vmem:[%s1573_s0 + $0x118] sm:$0xff]  ;;  %v18_v9 = vld [vmem:[%s1573_s0 + $0x20] sm:$0xff]  ;;  %v51_v12 = vld [vmem:[%s1573_s0 + $0x128] sm:$0xff] }
   0x5   :  { %871 = vmatmul.mubr.msk.f32.vlgmr.msra.gmra.mrb[0].mxu0 %vm86_vm1, %v15_v3  ;;  %919 = vmatmul.mubr.msk.f32.vlgmr.msra.gmra.mrb[0].mxu1 %vm86_vm1, %v47_v4  ;;  %v50_v10 = vld [vmem:[%s1573_s0 + $0x120] sm:$0xff]  ;;  %v20_v13 = vld [vmem:[%s1573_s0 + $0x30] sm:$0xff]  ;;  %v21_v15 = vld [vmem:[%s1573_s0 + $0x38] sm:$0xff] }
   0x6   :  { %873 = vmatprep.mubr.msk.f32.mxu0 %vm86_vm1, %v16_v5  ;;  %921 = vmatprep.mubr.msk.f32.mxu1 %vm86_vm1, %v48_v6  ;;  %v52_v14 = vld [vmem:[%s1573_s0 + $0x130] sm:$0xff]  ;;  %v53_v16 = vld [vmem:[%s1573_s0 + $0x138] sm:$0xff]  ;;  %v22_v17 = vld [vmem:[%s1573_s0 + $0x40] sm:$0xff] }
   0x7   :  { %v54_v18 = vld [vmem:[%s1573_s0 + $0x140] sm:$0xff]  ;;  %v23_v19 = vld [vmem:[%s1573_s0 + $0x48] sm:$0xff]  ;;  %v24_v21 = vld [vmem:[%s1573_s0 + $0x50] sm:$0xff] }
   0x8   :  { %v55_v20 = vld [vmem:[%s1573_s0 + $0x148] sm:$0xff]  ;;  %v56_v22 = vld [vmem:[%s1573_s0 + $0x150] sm:$0xff]  ;;  %v25_v23 = vld [vmem:[%s1573_s0 + $0x58] sm:$0xff] }
   0x9   :  { %874 = vmatmul.mubr.msk.f32.gmra.mrb[2].mxu0 %vm86_vm1, %v17_v7  ;;  %922 = vmatmul.mubr.msk.f32.gmra.mrb[2].mxu1 %vm86_vm1, %v49_v8  ;;  %v57_v24 = vld [vmem:[%s1573_s0 + $0x158] sm:$0xff]  ;;  %v26_v25 = vld [vmem:[%s1573_s0 + $0x60] sm:$0xff]  ;;  %v27_v27 = vld [vmem:[%s1573_s0 + $0x68] sm:$0xff] }
   0xa   :  { %876 = vmatprep.mubr.msk.f32.mxu0 %vm86_vm1, %v18_v9  ;;  %924 = vmatprep.mubr.msk.f32.mxu1 %vm86_vm1, %v50_v10  ;;  %v58_v26 = vld [vmem:[%s1573_s0 + $0x160] sm:$0xff]  ;;  %v59_v28 = vld [vmem:[%s1573_s0 + $0x168] sm:$0xff]  ;;  %v28_v29 = vld [vmem:[%s1573_s0 + $0x70] sm:$0xff] }
   0xb   :  { %v60_v30 = vld [vmem:[%s1573_s0 + $0x170] sm:$0xff]  ;;  %v29_v31 = vld [vmem:[%s1573_s0 + $0x78] sm:$0xff]  ;;  %v30_v33 = vld [vmem:[%s1573_s0 + $0x80] sm:$0xff] }
   0xc   :  { %v61_v32 = vld [vmem:[%s1573_s0 + $0x178] sm:$0xff]  ;;  %v62_v34 = vld [vmem:[%s1573_s0 + $0x180] sm:$0xff]  ;;  %v31_v35 = vld [vmem:[%s1573_s0 + $0x88] sm:$0xff] }
   0xd   :  { %877 = vmatmul.mubr.msk.f32.gmra.mrb[4].mxu0 %vm86_vm1, %v19_v11  ;;  %925 = vmatmul.mubr.msk.f32.gmra.mrb[4].mxu1 %vm86_vm1, %v51_v12  ;;  %v63_v36 = vld [vmem:[%s1573_s0 + $0x188] sm:$0xff]  ;;  %v32_v37 = vld [vmem:[%s1573_s0 + $0x90] sm:$0xff]  ;;  %v33_v39 = vld [vmem:[%s1573_s0 + $0x98] sm:$0xff] }
   0xe   :  { %879 = vmatprep.mubr.msk.f32.mxu0 %vm86_vm1, %v20_v13  ;;  %927 = vmatprep.mubr.msk.f32.mxu1 %vm86_vm1, %v52_v14  ;;  %v64_v38 = vld [vmem:[%s1573_s0 + $0x190] sm:$0xff]  ;;  %v65_v40 = vld [vmem:[%s1573_s0 + $0x198] sm:$0xff]  ;;  %v34_v41 = vld [vmem:[%s1573_s0 + $0xa0] sm:$0xff] }
   0xf   :  { %v66_v42 = vld [vmem:[%s1573_s0 + $0x1a0] sm:$0xff]  ;;  %v35_v43 = vld [vmem:[%s1573_s0 + $0xa8] sm:$0xff]  ;;  %v36_v45 = vld [vmem:[%s1573_s0 + $0xb0] sm:$0xff] }
  0x10   :  { %v67_v44 = vld [vmem:[%s1573_s0 + $0x1a8] sm:$0xff]  ;;  %v68_v46 = vld [vmem:[%s1573_s0 + $0x1b0] sm:$0xff]  ;;  %v37_v47 = vld [vmem:[%s1573_s0 + $0xb8] sm:$0xff] }
  0x11   :  { %880 = vmatmul.mubr.msk.f32.gmra.mrb[6].mxu0 %vm86_vm1, %v21_v15  ;;  %928 = vmatmul.mubr.msk.f32.gmra.mrb[6].mxu1 %vm86_vm1, %v53_v16  ;;  %v69_v48 = vld [vmem:[%s1573_s0 + $0x1b8] sm:$0xff]  ;;  %v38_v49 = vld [vmem:[%s1573_s0 + $0xc0] sm:$0xff]  ;;  %v39_v51 = vld [vmem:[%s1573_s0 + $0xc8] sm:$0xff] }
  0x12   :  { %882 = vmatprep.mubr.msk.f32.mxu0 %vm86_vm1, %v22_v17  ;;  %930 = vmatprep.mubr.msk.f32.mxu1 %vm86_vm1, %v54_v18  ;;  %v70_v50 = vld [vmem:[%s1573_s0 + $0x1c0] sm:$0xff]  ;;  %v71_v52 = vld [vmem:[%s1573_s0 + $0x1c8] sm:$0xff]  ;;  %v40_v53 = vld [vmem:[%s1573_s0 + $0xd0] sm:$0xff] }
  0x13   :  { %v72_v54 = vld [vmem:[%s1573_s0 + $0x1d0] sm:$0xff]  ;;  %v41_v55 = vld [vmem:[%s1573_s0 + $0xd8] sm:$0xff]  ;;  %v42_v57 = vld [vmem:[%s1573_s0 + $0xe0] sm:$0xff] }
  0x14   :  { %v73_v56 = vld [vmem:[%s1573_s0 + $0x1d8] sm:$0xff]  ;;  %v74_v58 = vld [vmem:[%s1573_s0 + $0x1e0] sm:$0xff]  ;;  %v43_v59 = vld [vmem:[%s1573_s0 + $0xe8] sm:$0xff] }
  0x15   :  { %883 = vmatmul.mubr.msk.f32.gmra.mrb[8].mxu0 %vm86_vm1, %v23_v19  ;;  %931 = vmatmul.mubr.msk.f32.gmra.mrb[8].mxu1 %vm86_vm1, %v55_v20  ;;  %v75_v60 = vld [vmem:[%s1573_s0 + $0x1e8] sm:$0xff]  ;;  %v44_v61 = vld [vmem:[%s1573_s0 + $0xf0] sm:$0xff]  ;;  %v45_v63 = vld [vmem:[%s1573_s0 + $0xf8] sm:$0xff] }
  0x16   :  { %885 = vmatprep.mubr.msk.f32.mxu0 %vm86_vm1, %v24_v21  ;;  %933 = vmatprep.mubr.msk.f32.mxu1 %vm86_vm1, %v56_v22  ;;  %v76_v62 = vld [vmem:[%s1573_s0 + $0x1f0] sm:$0xff]  ;;  %v77_v0 = vld [vmem:[%s1573_s0 + $0x1f8] sm:$0xff]  ;;  %v1250_v1 = vld [vmem:[%s1574_s2] ss:$0 sm:$0xff] }
  0x19   :  { %886 = vmatmul.mubr.msk.f32.gmra.mrb[10].mxu0 %vm86_vm1, %v25_v23  ;;  %934 = vmatmul.mubr.msk.f32.gmra.mrb[10].mxu1 %vm86_vm1, %v57_v24 }
  0x1a   :  { %888 = vmatprep.mubr.msk.f32.mxu0 %vm86_vm1, %v26_v25  ;;  %936 = vmatprep.mubr.msk.f32.mxu1 %vm86_vm1, %v58_v26 }
  0x1d   :  { %889 = vmatmul.mubr.msk.f32.gmra.mrb[12].mxu0 %vm86_vm1, %v27_v27  ;;  %937 = vmatmul.mubr.msk.f32.gmra.mrb[12].mxu1 %vm86_vm1, %v59_v28 }
  0x1e   :  { %891 = vmatprep.mubr.msk.f32.mxu0 %vm86_vm1, %v28_v29  ;;  %939 = vmatprep.mubr.msk.f32.mxu1 %vm86_vm1, %v60_v30 }
  0x21   :  { %892 = vmatmul.mubr.msk.f32.gmra.mrb[14].mxu0 %vm86_vm1, %v29_v31  ;;  %940 = vmatmul.mubr.msk.f32.gmra.mrb[14].mxu1 %vm86_vm1, %v61_v32 }
  0x22   :  { %894 = vmatprep.mubr.msk.f32.mxu0 %vm86_vm1, %v30_v33  ;;  %942 = vmatprep.mubr.msk.f32.mxu1 %vm86_vm1, %v62_v34 }
  0x25   :  { %895 = vmatmul.mubr.msk.f32.gmra.mrb[16].mxu0 %vm86_vm1, %v31_v35  ;;  %943 = vmatmul.mubr.msk.f32.gmra.mrb[16].mxu1 %vm86_vm1, %v63_v36 }
  0x26   :  { %897 = vmatprep.mubr.msk.f32.mxu0 %vm86_vm1, %v32_v37  ;;  %945 = vmatprep.mubr.msk.f32.mxu1 %vm86_vm1, %v64_v38 }
  0x29   :  { %898 = vmatmul.mubr.msk.f32.gmra.mrb[18].mxu0 %vm86_vm1, %v33_v39  ;;  %946 = vmatmul.mubr.msk.f32.gmra.mrb[18].mxu1 %vm86_vm1, %v65_v40 }
  0x2a   :  { %900 = vmatprep.mubr.msk.f32.mxu0 %vm86_vm1, %v34_v41  ;;  %948 = vmatprep.mubr.msk.f32.mxu1 %vm86_vm1, %v66_v42 }
  0x2d   :  { %901 = vmatmul.mubr.msk.f32.gmra.mrb[20].mxu0 %vm86_vm1, %v35_v43  ;;  %949 = vmatmul.mubr.msk.f32.gmra.mrb[20].mxu1 %vm86_vm1, %v67_v44 }
  0x2e   :  { %903 = vmatprep.mubr.msk.f32.mxu0 %vm86_vm1, %v36_v45  ;;  %951 = vmatprep.mubr.msk.f32.mxu1 %vm86_vm1, %v68_v46 }
  0x31   :  { %904 = vmatmul.mubr.msk.f32.gmra.mrb[22].mxu0 %vm86_vm1, %v37_v47  ;;  %952 = vmatmul.mubr.msk.f32.gmra.mrb[22].mxu1 %vm86_vm1, %v69_v48 }
  0x32   :  { %906 = vmatprep.mubr.msk.f32.mxu0 %vm86_vm1, %v38_v49  ;;  %954 = vmatprep.mubr.msk.f32.mxu1 %vm86_vm1, %v70_v50 }
  0x35   :  { %907 = vmatmul.mubr.msk.f32.gmra.mrb[24].mxu0 %vm86_vm1, %v39_v51  ;;  %955 = vmatmul.mubr.msk.f32.gmra.mrb[24].mxu1 %vm86_vm1, %v71_v52 }
  0x36   :  { %909 = vmatprep.mubr.msk.f32.mxu0 %vm86_vm1, %v40_v53  ;;  %957 = vmatprep.mubr.msk.f32.mxu1 %vm86_vm1, %v72_v54 }
  0x39   :  { %910 = vmatmul.mubr.msk.f32.gmra.mrb[26].mxu0 %vm86_vm1, %v41_v55  ;;  %958 = vmatmul.mubr.msk.f32.gmra.mrb[26].mxu1 %vm86_vm1, %v73_v56 }
  0x3a   :  { %912 = vmatprep.mubr.msk.f32.mxu0 %vm86_vm1, %v42_v57  ;;  %960 = vmatprep.mubr.msk.f32.mxu1 %vm86_vm1, %v74_v58 }
  0x3d   :  { %913 = vmatmul.mubr.msk.f32.gmra.mrb[28].mxu0 %vm86_vm1, %v43_v59  ;;  %961 = vmatmul.mubr.msk.f32.gmra.mrb[28].mxu1 %vm86_vm1, %v75_v60 }
  0x3e   :  { %915 = vmatprep.mubr.msk.f32.mxu0 %vm86_vm1, %v44_v61  ;;  %963 = vmatprep.mubr.msk.f32.mxu1 %vm86_vm1, %v76_v62 }
  0x41   :  { %916 = vmatmul.mubr.msk.f32.gmra.mrb[30].mxu0 %vm86_vm1, %v45_v63  ;;  %964 = vmatmul.mubr.msk.f32.gmra.mrb[30].mxu1 %vm86_vm1, %v77_v0 }
  0xd8   :  { %v872_v2 = vpop.f32.mrb[0].mxu0  ;;  %v920_v3 = vpop.f32.mrb[0].mxu1 }
  0xd9   :  { %v355_v4 = vadd.f32 %v872_v2, %v1250_v1  ;;  %v515_v5 = vadd.f32 %v920_v3, %v1250_v1  ;;  %v349_v6 = vpop.f32.mrb[1].mxu0  ;;  %v509_v7 = vpop.f32.mrb[1].mxu1 }
  0xda   :  { %v350_v8 = vadd.f32 %v1250_v1, %v349_v6  ;;  %v510_v9 = vadd.f32 %v1250_v1, %v509_v7 }
  0xdb   :  { %670 = vst.msk [vmem:[%s1575_s3 + $0x8] sm:$0xff] %vm668_vm2, %v355_v4  ;;  %702 = vst.msk [vmem:[%s1575_s3 + $0x108] sm:$0xff] %vm668_vm2, %v515_v5 }
  0xdc   :  { %669 = vst.msk [vmem:[%s1575_s3] sm:$0xff] %vm668_vm2, %v350_v8  ;;  %701 = vst.msk [vmem:[%s1575_s3 + $0x100] sm:$0xff] %vm668_vm2, %v510_v9  ;;  %v875_v10 = vpop.f32.mrb[2].mxu0  ;;  %v923_v11 = vpop.f32.mrb[2].mxu1 }
  0xdd   :  { %v365_v12 = vadd.f32 %v875_v10, %v1250_v1  ;;  %v525_v13 = vadd.f32 %v923_v11, %v1250_v1  ;;  %v359_v14 = vpop.f32.mrb[3].mxu0  ;;  %v519_v15 = vpop.f32.mrb[3].mxu1 }
  0xde   :  { %v360_v16 = vadd.f32 %v1250_v1, %v359_v14  ;;  %v520_v17 = vadd.f32 %v1250_v1, %v519_v15 }
  0xdf   :  { %672 = vst.msk [vmem:[%s1575_s3 + $0x18] sm:$0xff] %vm668_vm2, %v365_v12  ;;  %704 = vst.msk [vmem:[%s1575_s3 + $0x118] sm:$0xff] %vm668_vm2, %v525_v13 }
  0xe0   :  { %671 = vst.msk [vmem:[%s1575_s3 + $0x10] sm:$0xff] %vm668_vm2, %v360_v16  ;;  %703 = vst.msk [vmem:[%s1575_s3 + $0x110] sm:$0xff] %vm668_vm2, %v520_v17  ;;  %v878_v18 = vpop.f32.mrb[4].mxu0  ;;  %v926_v19 = vpop.f32.mrb[4].mxu1 }
  0xe1   :  { %v375_v20 = vadd.f32 %v878_v18, %v1250_v1  ;;  %v535_v21 = vadd.f32 %v926_v19, %v1250_v1  ;;  %v369_v22 = vpop.f32.mrb[5].mxu0  ;;  %v529_v23 = vpop.f32.mrb[5].mxu1 }
  0xe2   :  { %v370_v24 = vadd.f32 %v1250_v1, %v369_v22  ;;  %v530_v25 = vadd.f32 %v1250_v1, %v529_v23 }
  0xe3   :  { %674 = vst.msk [vmem:[%s1575_s3 + $0x28] sm:$0xff] %vm668_vm2, %v375_v20  ;;  %706 = vst.msk [vmem:[%s1575_s3 + $0x128] sm:$0xff] %vm668_vm2, %v535_v21 }
  0xe4   :  { %673 = vst.msk [vmem:[%s1575_s3 + $0x20] sm:$0xff] %vm668_vm2, %v370_v24  ;;  %705 = vst.msk [vmem:[%s1575_s3 + $0x120] sm:$0xff] %vm668_vm2, %v530_v25  ;;  %v881_v26 = vpop.f32.mrb[6].mxu0  ;;  %v929_v27 = vpop.f32.mrb[6].mxu1 }
  0xe5   :  { %v385_v28 = vadd.f32 %v881_v26, %v1250_v1  ;;  %v545_v29 = vadd.f32 %v929_v27, %v1250_v1  ;;  %v379_v30 = vpop.f32.mrb[7].mxu0  ;;  %v539_v31 = vpop.f32.mrb[7].mxu1 }
  0xe6   :  { %v380_v32 = vadd.f32 %v1250_v1, %v379_v30  ;;  %v540_v33 = vadd.f32 %v1250_v1, %v539_v31 }
  0xe7   :  { %676 = vst.msk [vmem:[%s1575_s3 + $0x38] sm:$0xff] %vm668_vm2, %v385_v28  ;;  %708 = vst.msk [vmem:[%s1575_s3 + $0x138] sm:$0xff] %vm668_vm2, %v545_v29 }
  0xe8   :  { %675 = vst.msk [vmem:[%s1575_s3 + $0x30] sm:$0xff] %vm668_vm2, %v380_v32  ;;  %707 = vst.msk [vmem:[%s1575_s3 + $0x130] sm:$0xff] %vm668_vm2, %v540_v33  ;;  %v884_v34 = vpop.f32.mrb[8].mxu0  ;;  %v932_v35 = vpop.f32.mrb[8].mxu1 }
  0xe9   :  { %v395_v36 = vadd.f32 %v884_v34, %v1250_v1  ;;  %v555_v37 = vadd.f32 %v932_v35, %v1250_v1  ;;  %v389_v38 = vpop.f32.mrb[9].mxu0  ;;  %v549_v39 = vpop.f32.mrb[9].mxu1 }
  0xea   :  { %v390_v40 = vadd.f32 %v1250_v1, %v389_v38  ;;  %v550_v41 = vadd.f32 %v1250_v1, %v549_v39 }
  0xeb   :  { %678 = vst.msk [vmem:[%s1575_s3 + $0x48] sm:$0xff] %vm668_vm2, %v395_v36  ;;  %710 = vst.msk [vmem:[%s1575_s3 + $0x148] sm:$0xff] %vm668_vm2, %v555_v37 }
  0xec   :  { %677 = vst.msk [vmem:[%s1575_s3 + $0x40] sm:$0xff] %vm668_vm2, %v390_v40  ;;  %709 = vst.msk [vmem:[%s1575_s3 + $0x140] sm:$0xff] %vm668_vm2, %v550_v41  ;;  %v887_v42 = vpop.f32.mrb[10].mxu0  ;;  %v935_v43 = vpop.f32.mrb[10].mxu1 }
  0xed   :  { %v405_v44 = vadd.f32 %v887_v42, %v1250_v1  ;;  %v565_v45 = vadd.f32 %v935_v43, %v1250_v1  ;;  %v399_v46 = vpop.f32.mrb[11].mxu0  ;;  %v559_v47 = vpop.f32.mrb[11].mxu1 }
  0xee   :  { %v400_v48 = vadd.f32 %v1250_v1, %v399_v46  ;;  %v560_v49 = vadd.f32 %v1250_v1, %v559_v47 }
  0xef   :  { %680 = vst.msk [vmem:[%s1575_s3 + $0x58] sm:$0xff] %vm668_vm2, %v405_v44  ;;  %712 = vst.msk [vmem:[%s1575_s3 + $0x158] sm:$0xff] %vm668_vm2, %v565_v45 }
  0xf0   :  { %679 = vst.msk [vmem:[%s1575_s3 + $0x50] sm:$0xff] %vm668_vm2, %v400_v48  ;;  %711 = vst.msk [vmem:[%s1575_s3 + $0x150] sm:$0xff] %vm668_vm2, %v560_v49  ;;  %v890_v50 = vpop.f32.mrb[12].mxu0  ;;  %v938_v51 = vpop.f32.mrb[12].mxu1 }
  0xf1   :  { %v415_v52 = vadd.f32 %v890_v50, %v1250_v1  ;;  %v575_v53 = vadd.f32 %v938_v51, %v1250_v1  ;;  %v409_v54 = vpop.f32.mrb[13].mxu0  ;;  %v569_v55 = vpop.f32.mrb[13].mxu1 }
  0xf2   :  { %v410_v56 = vadd.f32 %v1250_v1, %v409_v54  ;;  %v570_v57 = vadd.f32 %v1250_v1, %v569_v55 }
  0xf3   :  { %682 = vst.msk [vmem:[%s1575_s3 + $0x68] sm:$0xff] %vm668_vm2, %v415_v52  ;;  %714 = vst.msk [vmem:[%s1575_s3 + $0x168] sm:$0xff] %vm668_vm2, %v575_v53 }
  0xf4   :  { %681 = vst.msk [vmem:[%s1575_s3 + $0x60] sm:$0xff] %vm668_vm2, %v410_v56  ;;  %713 = vst.msk [vmem:[%s1575_s3 + $0x160] sm:$0xff] %vm668_vm2, %v570_v57  ;;  %v893_v58 = vpop.f32.mrb[14].mxu0  ;;  %v941_v59 = vpop.f32.mrb[14].mxu1 }
  0xf5   :  { %v425_v60 = vadd.f32 %v893_v58, %v1250_v1  ;;  %v585_v61 = vadd.f32 %v941_v59, %v1250_v1  ;;  %v419_v62 = vpop.f32.mrb[15].mxu0  ;;  %v579_v63 = vpop.f32.mrb[15].mxu1 }
  0xf6   :  { %v420_v0 = vadd.f32 %v1250_v1, %v419_v62  ;;  %v580_v2 = vadd.f32 %v1250_v1, %v579_v63 }
  0xf7   :  { %684 = vst.msk [vmem:[%s1575_s3 + $0x78] sm:$0xff] %vm668_vm2, %v425_v60  ;;  %716 = vst.msk [vmem:[%s1575_s3 + $0x178] sm:$0xff] %vm668_vm2, %v585_v61 }
  0xf8   :  { %683 = vst.msk [vmem:[%s1575_s3 + $0x70] sm:$0xff] %vm668_vm2, %v420_v0  ;;  %715 = vst.msk [vmem:[%s1575_s3 + $0x170] sm:$0xff] %vm668_vm2, %v580_v2  ;;  %v896_v3 = vpop.f32.mrb[16].mxu0  ;;  %v944_v4 = vpop.f32.mrb[16].mxu1 }
  0xf9   :  { %v435_v5 = vadd.f32 %v896_v3, %v1250_v1  ;;  %v595_v6 = vadd.f32 %v944_v4, %v1250_v1  ;;  %v429_v7 = vpop.f32.mrb[17].mxu0  ;;  %v589_v8 = vpop.f32.mrb[17].mxu1 }
  0xfa   :  { %v430_v9 = vadd.f32 %v1250_v1, %v429_v7  ;;  %v590_v10 = vadd.f32 %v1250_v1, %v589_v8 }
  0xfb   :  { %686 = vst.msk [vmem:[%s1575_s3 + $0x88] sm:$0xff] %vm668_vm2, %v435_v5  ;;  %718 = vst.msk [vmem:[%s1575_s3 + $0x188] sm:$0xff] %vm668_vm2, %v595_v6 }
  0xfc   :  { %685 = vst.msk [vmem:[%s1575_s3 + $0x80] sm:$0xff] %vm668_vm2, %v430_v9  ;;  %717 = vst.msk [vmem:[%s1575_s3 + $0x180] sm:$0xff] %vm668_vm2, %v590_v10  ;;  %v899_v11 = vpop.f32.mrb[18].mxu0  ;;  %v947_v12 = vpop.f32.mrb[18].mxu1 }
  0xfd   :  { %v445_v13 = vadd.f32 %v899_v11, %v1250_v1  ;;  %v605_v14 = vadd.f32 %v947_v12, %v1250_v1  ;;  %v439_v15 = vpop.f32.mrb[19].mxu0  ;;  %v599_v16 = vpop.f32.mrb[19].mxu1 }
  0xfe   :  { %v440_v17 = vadd.f32 %v1250_v1, %v439_v15  ;;  %v600_v18 = vadd.f32 %v1250_v1, %v599_v16 }
  0xff   :  { %688 = vst.msk [vmem:[%s1575_s3 + $0x98] sm:$0xff] %vm668_vm2, %v445_v13  ;;  %720 = vst.msk [vmem:[%s1575_s3 + $0x198] sm:$0xff] %vm668_vm2, %v605_v14 }
 0x100   :  { %687 = vst.msk [vmem:[%s1575_s3 + $0x90] sm:$0xff] %vm668_vm2, %v440_v17  ;;  %719 = vst.msk [vmem:[%s1575_s3 + $0x190] sm:$0xff] %vm668_vm2, %v600_v18  ;;  %v902_v19 = vpop.f32.mrb[20].mxu0  ;;  %v950_v20 = vpop.f32.mrb[20].mxu1 }
 0x101   :  { %v455_v21 = vadd.f32 %v902_v19, %v1250_v1  ;;  %v615_v22 = vadd.f32 %v950_v20, %v1250_v1  ;;  %v449_v23 = vpop.f32.mrb[21].mxu0  ;;  %v609_v24 = vpop.f32.mrb[21].mxu1 }
 0x102   :  { %v450_v25 = vadd.f32 %v1250_v1, %v449_v23  ;;  %v610_v26 = vadd.f32 %v1250_v1, %v609_v24 }
 0x103   :  { %690 = vst.msk [vmem:[%s1575_s3 + $0xa8] sm:$0xff] %vm668_vm2, %v455_v21  ;;  %722 = vst.msk [vmem:[%s1575_s3 + $0x1a8] sm:$0xff] %vm668_vm2, %v615_v22 }
 0x104   :  { %689 = vst.msk [vmem:[%s1575_s3 + $0xa0] sm:$0xff] %vm668_vm2, %v450_v25  ;;  %721 = vst.msk [vmem:[%s1575_s3 + $0x1a0] sm:$0xff] %vm668_vm2, %v610_v26  ;;  %v905_v27 = vpop.f32.mrb[22].mxu0  ;;  %v953_v28 = vpop.f32.mrb[22].mxu1 }
 0x105   :  { %v465_v29 = vadd.f32 %v905_v27, %v1250_v1  ;;  %v625_v30 = vadd.f32 %v953_v28, %v1250_v1  ;;  %v459_v31 = vpop.f32.mrb[23].mxu0  ;;  %v619_v32 = vpop.f32.mrb[23].mxu1 }
 0x106   :  { %v460_v33 = vadd.f32 %v1250_v1, %v459_v31  ;;  %v620_v34 = vadd.f32 %v1250_v1, %v619_v32 }
 0x107   :  { %692 = vst.msk [vmem:[%s1575_s3 + $0xb8] sm:$0xff] %vm668_vm2, %v465_v29  ;;  %724 = vst.msk [vmem:[%s1575_s3 + $0x1b8] sm:$0xff] %vm668_vm2, %v625_v30 }
 0x108   :  { %691 = vst.msk [vmem:[%s1575_s3 + $0xb0] sm:$0xff] %vm668_vm2, %v460_v33  ;;  %723 = vst.msk [vmem:[%s1575_s3 + $0x1b0] sm:$0xff] %vm668_vm2, %v620_v34  ;;  %v908_v35 = vpop.f32.mrb[24].mxu0  ;;  %v956_v36 = vpop.f32.mrb[24].mxu1 }
 0x109   :  { %v475_v37 = vadd.f32 %v908_v35, %v1250_v1  ;;  %v635_v38 = vadd.f32 %v956_v36, %v1250_v1  ;;  %v469_v39 = vpop.f32.mrb[25].mxu0  ;;  %v629_v40 = vpop.f32.mrb[25].mxu1 }
 0x10a   :  { %v470_v41 = vadd.f32 %v1250_v1, %v469_v39  ;;  %v630_v42 = vadd.f32 %v1250_v1, %v629_v40 }
 0x10b   :  { %694 = vst.msk [vmem:[%s1575_s3 + $0xc8] sm:$0xff] %vm668_vm2, %v475_v37  ;;  %726 = vst.msk [vmem:[%s1575_s3 + $0x1c8] sm:$0xff] %vm668_vm2, %v635_v38 }
 0x10c   :  { %693 = vst.msk [vmem:[%s1575_s3 + $0xc0] sm:$0xff] %vm668_vm2, %v470_v41  ;;  %725 = vst.msk [vmem:[%s1575_s3 + $0x1c0] sm:$0xff] %vm668_vm2, %v630_v42  ;;  %v911_v43 = vpop.f32.mrb[26].mxu0  ;;  %v959_v44 = vpop.f32.mrb[26].mxu1 }
 0x10d   :  { %v485_v45 = vadd.f32 %v911_v43, %v1250_v1  ;;  %v645_v46 = vadd.f32 %v959_v44, %v1250_v1  ;;  %v479_v47 = vpop.f32.mrb[27].mxu0  ;;  %v639_v48 = vpop.f32.mrb[27].mxu1 }
 0x10e   :  { %v480_v49 = vadd.f32 %v1250_v1, %v479_v47  ;;  %v640_v50 = vadd.f32 %v1250_v1, %v639_v48 }
 0x10f   :  { %696 = vst.msk [vmem:[%s1575_s3 + $0xd8] sm:$0xff] %vm668_vm2, %v485_v45  ;;  %728 = vst.msk [vmem:[%s1575_s3 + $0x1d8] sm:$0xff] %vm668_vm2, %v645_v46 }
 0x110   :  { %695 = vst.msk [vmem:[%s1575_s3 + $0xd0] sm:$0xff] %vm668_vm2, %v480_v49  ;;  %727 = vst.msk [vmem:[%s1575_s3 + $0x1d0] sm:$0xff] %vm668_vm2, %v640_v50  ;;  %v914_v51 = vpop.f32.mrb[28].mxu0  ;;  %v962_v52 = vpop.f32.mrb[28].mxu1 }
 0x111   :  { %v495_v53 = vadd.f32 %v914_v51, %v1250_v1  ;;  %v655_v54 = vadd.f32 %v962_v52, %v1250_v1  ;;  %v489_v55 = vpop.f32.mrb[29].mxu0  ;;  %v649_v56 = vpop.f32.mrb[29].mxu1 }
 0x112   :  { %v490_v57 = vadd.f32 %v1250_v1, %v489_v55  ;;  %v650_v58 = vadd.f32 %v1250_v1, %v649_v56 }
 0x113   :  { %698 = vst.msk [vmem:[%s1575_s3 + $0xe8] sm:$0xff] %vm668_vm2, %v495_v53  ;;  %730 = vst.msk [vmem:[%s1575_s3 + $0x1e8] sm:$0xff] %vm668_vm2, %v655_v54 }
 0x114   :  { %697 = vst.msk [vmem:[%s1575_s3 + $0xe0] sm:$0xff] %vm668_vm2, %v490_v57  ;;  %729 = vst.msk [vmem:[%s1575_s3 + $0x1e0] sm:$0xff] %vm668_vm2, %v650_v58  ;;  %v917_v59 = vpop.f32.mrb[30].mxu0  ;;  %v965_v60 = vpop.f32.mrb[30].mxu1 }
 0x115   :  { %v505_v61 = vadd.f32 %v917_v59, %v1250_v1  ;;  %v665_v62 = vadd.f32 %v965_v60, %v1250_v1  ;;  %v499_v63 = vpop.f32.mrb[31].mxu0  ;;  %v659_v0 = vpop.f32.mrb[31].mxu1 }
 0x116   :  { %v500_v2 = vadd.f32 %v1250_v1, %v499_v63  ;;  %v660_v3 = vadd.f32 %v1250_v1, %v659_v0 }
 0x117   :  { %700 = vst.msk [vmem:[%s1575_s3 + $0xf8] sm:$0xff] %vm668_vm2, %v505_v61  ;;  %732 = vst.msk [vmem:[%s1575_s3 + $0x1f8] sm:$0xff] %vm668_vm2, %v665_v62 }
 0x118   :  { %699 = vst.msk [vmem:[%s1575_s3 + $0xf0] sm:$0xff] %vm668_vm2, %v500_v2  ;;  %731 = vst.msk [vmem:[%s1575_s3 + $0x1f0] sm:$0xff] %vm668_vm2, %v660_v3 }

</bundles_post_ra>
